<compile_context>
chip_gen: v7x
topology: tpu7x:2x2x1
jax: 0.10.0
libtpu: 0.0.40
codegen_flags: <defaults>
</compile_context>

<pallas_src>
import functools

import jax
import jax.numpy as jnp
from jax.experimental import pallas as pl
from jax.experimental.pallas import tpu as pltpu

LANES = 128


def _round_up(x, m=LANES):
    return ((x + m - 1) // m) * m


def attn_decoder_kernel(
    inp_ref,    # (1, B, 1)      per-step scalar input (streamed)
    act_ref,    # (B, SFp+256)   resident: [enc | mask_clip | h0]
    wk_ref,     # (SFp, 256)     resident: [:,0:128]=w_e_sel(pad), [:,128:128+H]=w_cf_big
    wihh_ref,   # (2H, 128)      resident: rows [0:H]=W_ih fused, [H:2H]=W_hh fused(+attn col)
    vec_ref,    # (8, 128)       resident row-vectors / scalars
    exp_ref,    # (128, SFp)     resident block row-replication matrix
    step_ref,   # (1, B, 256)    per-step output slab (lane-dense store)
    hid_ref,    # (B, H)         final hidden (resident output, written back once)
    h_sc,       # VMEM (B, H)    hidden carried across decode steps
    *, S, H, SFp,
):
    f32 = jnp.float32
    B = hid_ref.shape[0]
    t = pl.program_id(0)

    @pl.when(t == 0)
    def _():
        h_sc[...] = act_ref[:, SFp + LANES:SFp + LANES + H]   # initial hidden

    h = h_sc[...]                            # (B, H)
    inp = inp_ref[0]                         # (B, 1)
    enc = act_ref[:, 0:SFp]                  # (B, SFp)
    mask_clip = act_ref[:, SFp:SFp + LANES]  # (B, 128) precomputed clip values

    # packed row-vector / scalar operands (all lane-offset-0 slices)
    b_gi = vec_ref[0:1, :]                   # (1, 128)
    b_gh = vec_ref[1:2, :]                   # (1, 128)   lane 3H holds attn bias b_a
    w_ci = vec_ref[2:3, 0:H]                 # (1, H)
    b_c = vec_ref[3:4, 0:H]                  # (1, H)
    w_o = vec_ref[4:5, 0:H]                  # (1, H)
    w_ai = vec_ref[5:6, 0:1]                 # (1, 1)
    b_o = vec_ref[6:7, 0:1]                  # (1, 1)

    # ---- fused hidden->gates matmul (also yields the attention hidden term) --
    gh_all = jnp.dot(h, wihh_ref[H:2 * H, :], preferred_element_type=f32) + b_gh
    s_h = gh_all[:, 3 * H:3 * H + 1]         # (B, 1): h @ W_a[:,F:F+H].T + b_a

    # ---- attention scores (full 128-lane width; lanes >= S are padding) ------
    s_e = jnp.dot(enc, wk_ref[:, 0:LANES], preferred_element_type=f32)   # (B, 128)
    scores = jnp.minimum(s_e + s_h + inp * w_ai, mask_clip)              # exact masked_fill
    m = jnp.max(scores, axis=1, keepdims=True)
    e = jnp.exp(scores - m)                  # padding lanes underflow to exactly 0
    denom = jnp.sum(e, axis=1, keepdims=True)
    inv = pl.reciprocal(denom, approx=True)  # EUP vrcp (off the VALU path)
    inv = inv * (2.0 - denom * inv)          # one Newton step -> f32 accuracy
    aw = e * inv                             # (B, 128): softmax weights, lanes>=S are 0

    # ---- attn_combine(cat(input, attn_applied)) + ReLU ------------------------
    aw_rep = jnp.dot(aw, exp_ref[...], preferred_element_type=f32)       # (B, SFp)
    weighted = aw_rep * enc
    comb = (inp * w_ci
            + jnp.dot(weighted, wk_ref[:, LANES:LANES + H], preferred_element_type=f32)
            + b_c)                                                       # (B, H)
    x = jnp.maximum(comb, 0.0)
    # TODO(synk): dropout is applied as identity (eval mode); no stochastic mask.

    # ---- single-step GRU: one fused input->gates matmul -----------------------
    gi_all = jnp.dot(x, wihh_ref[0:H, :], preferred_element_type=f32) + b_gi
    r = jax.nn.sigmoid(gi_all[:, 0:H] + gh_all[:, 0:H])
    z = jax.nn.sigmoid(gi_all[:, H:2 * H] + gh_all[:, H:2 * H])
    n = jnp.tanh(gi_all[:, 2 * H:3 * H] + r * gh_all[:, 2 * H:3 * H])
    h_new = (1.0 - z) * n + z * h                                        # (B, H)

    # ---- ReLU -> (dropout=identity) -> out Linear(H -> 1) ---------------------
    go = jnp.maximum(h_new, 0.0)
    out_val = jnp.sum(go * w_o, axis=1, keepdims=True) + b_o             # (B, 1)

    # carry hidden; write resident hidden output; one lane-dense per-step store
    h_sc[...] = h_new
    hid_ref[...] = h_new
    pad = jnp.zeros((B, 256 - LANES - 1), f32)
    step_ref[0] = jnp.concatenate([aw, out_val, pad], axis=1)            # (B, 256)


def prepare_params(params, S, F, H):
    """One-time layout plumbing (hoisted out of the hot path)."""
    f32 = jnp.float32
    SF = S * F
    SFp = _round_up(SF)
    assert 3 * H + 1 <= LANES and H % 8 == 0 and S <= LANES, "unsupported sizes"

    W_a, b_a = params["attn_w"].astype(f32), params["attn_b"].astype(f32)    # (1,F+H+1),(1,)
    W_c, b_c = params["comb_w"].astype(f32), params["comb_b"].astype(f32)    # (H,F+1),(H,)
    W_ih, b_ih = params["gru_w_ih"].astype(f32), params["gru_b_ih"].astype(f32)  # (3H,H),(3H,)
    W_hh, b_hh = params["gru_w_hh"].astype(f32), params["gru_b_hh"].astype(f32)  # (3H,H),(3H,)
    W_o, b_o = params["out_w"].astype(f32), params["out_b"].astype(f32)      # (1,H),(1,)

    # attn Linear split over the concat order [enc | hidden | input].
    w_ae = W_a[0, :F]
    w_ah = W_a[:, F:F + H]
    w_ai = W_a[0, F + H]

    # wk slab: block-diagonal score weight (padded to 128 output lanes) and
    # the tiled combine weight, both with contraction dim = SFp rows.
    w_e_sel = jnp.kron(jnp.eye(S, dtype=f32), w_ae[:, None])                # (S*F, S)
    w_cf_big = jnp.tile(W_c[:, 1:].T, (S, 1))                               # (S*F, H)
    wk = jnp.zeros((SFp, 2 * LANES), f32)
    wk = wk.at[:SF, 0:S].set(w_e_sel)
    wk = wk.at[:SF, LANES:LANES + H].set(w_cf_big)

    # fused GRU weights (gate order r|z|n, zero-padded to 128 lanes;
    # W_hh additionally carries the attention hidden weight in lane 3H)
    w_ih_all = jnp.zeros((H, LANES), f32).at[:, 0:3 * H].set(
        jnp.concatenate([W_ih[0:H].T, W_ih[H:2 * H].T, W_ih[2 * H:3 * H].T], axis=1))
    w_hh_all = jnp.zeros((H, LANES), f32).at[:, 0:3 * H].set(
        jnp.concatenate([W_hh[0:H].T, W_hh[H:2 * H].T, W_hh[2 * H:3 * H].T], axis=1))
    w_hh_all = w_hh_all.at[:, 3 * H:3 * H + 1].set(w_ah.T)
    wihh = jnp.concatenate([w_ih_all, w_hh_all], axis=0)                    # (2H, 128)

    b_gi = jnp.zeros((LANES,), f32)
    b_gi = b_gi.at[0:2 * H].set(b_ih[0:2 * H] + b_hh[0:2 * H])
    b_gi = b_gi.at[2 * H:3 * H].set(b_ih[2 * H:3 * H])
    b_gh = jnp.zeros((LANES,), f32).at[2 * H:3 * H].set(b_hh[2 * H:3 * H]).at[3 * H].set(b_a[0])

    vec = jnp.zeros((8, LANES), f32)
    vec = vec.at[0, :].set(b_gi)
    vec = vec.at[1, :].set(b_gh)
    vec = vec.at[2, 0:H].set(W_c[:, 0])      # w_ci
    vec = vec.at[3, 0:H].set(b_c)
    vec = vec.at[4, 0:H].set(W_o[0])
    vec = vec.at[5, 0].set(w_ai)
    vec = vec.at[6, 0].set(b_o[0])

    # expand[s, s*F+f] = 1 : replicates each softmax weight F times.
    expand = jnp.zeros((LANES, SFp), f32).at[:S, :SF].set(
        jnp.kron(jnp.eye(S, dtype=f32), jnp.ones((1, F), f32)))

    return dict(wk=wk, wihh=wihh, vec=vec, expand=expand, S=S, F=F, H=H, SFp=SFp)


def prepare_inputs(prepped, hidden, enc, mask):
    """One-time per-sequence activation packing: [enc | mask_clip | h0]."""
    f32 = jnp.float32
    S, F, H, SFp = prepped["S"], prepped["F"], prepped["H"], prepped["SFp"]
    B = enc.shape[0]
    act = jnp.zeros((B, SFp + 2 * LANES), f32)
    act = act.at[:, 0:S * F].set(enc.reshape(B, S * F).astype(f32))
    clip = jnp.full((B, LANES), jnp.float32(-1e30))               # padding lanes
    clip = clip.at[:, :S].set(jnp.where(mask == 0, jnp.float32(-1e10), jnp.float32(3e38)))
    act = act.at[:, SFp:SFp + LANES].set(clip)
    act = act.at[:, SFp + LANES:SFp + LANES + H].set(hidden.reshape(B, H).astype(f32))
    return act


def attn_decoder_decode(prepped, act, inp_seq):
    """Run T sequential decoder steps inside a single pallas_call.

    inp_seq: (T, B, 1).  Returns (outs (T,B), hidden (B,H), attn_w (T,B,S)).
    """
    f32 = jnp.float32
    S, H, SFp = prepped["S"], prepped["H"], prepped["SFp"]
    T, B, _ = inp_seq.shape

    grid_spec = pltpu.PrefetchScalarGridSpec(
        num_scalar_prefetch=0,
        grid=(T,),
        in_specs=[
            pl.BlockSpec((1, B, 1), lambda t: (t, 0, 0)),            # streamed per step
            pl.BlockSpec(act.shape, lambda t: (0, 0)),               # resident
            pl.BlockSpec(prepped["wk"].shape, lambda t: (0, 0)),     # resident
            pl.BlockSpec(prepped["wihh"].shape, lambda t: (0, 0)),   # resident
            pl.BlockSpec(prepped["vec"].shape, lambda t: (0, 0)),    # resident
            pl.BlockSpec(prepped["expand"].shape, lambda t: (0, 0)), # resident
        ],
        out_specs=(
            pl.BlockSpec((1, B, 256), lambda t: (t, 0, 0)),          # per-step slab
            pl.BlockSpec((B, H), lambda t: (0, 0)),                  # final hidden (resident)
        ),
        scratch_shapes=[pltpu.VMEM((B, H), f32)],                    # carried hidden
    )
    step_out, hid = pl.pallas_call(
        functools.partial(attn_decoder_kernel, S=S, H=H, SFp=SFp),
        grid_spec=grid_spec,
        out_shape=(
            jax.ShapeDtypeStruct((T, B, 256), f32),
            jax.ShapeDtypeStruct((B, H), f32),
        ),
        compiler_params=pltpu.CompilerParams(dimension_semantics=("arbitrary",)),
    )(inp_seq.astype(f32), act, prepped["wk"], prepped["wihh"],
      prepped["vec"], prepped["expand"])

    outs = step_out[:, :, LANES]        # (T, B)
    attnw = step_out[:, :, :S]          # (T, B, S)
    return outs, hid, attnw


def attn_decoder_forward(params, inp, hidden, enc, mask):
    """Single-step module-equivalent wrapper (T=1).  Returns (output, hidden, attn_weights)."""
    B, S, F = enc.shape
    H = hidden.shape[-1]
    prepped = prepare_params(params, S, F, H)
    act = prepare_inputs(prepped, hidden, enc, mask)
    outs, hid, attnw = attn_decoder_decode(prepped, act, inp.reshape(1, B, 1))
    return outs[0], hid.reshape(1, B, H), attnw[0].reshape(B, S, 1)


def reference_forward(params, inp, hidden, enc, mask):
    """Pure-JAX mirror of the PyTorch forward (eval mode)."""
    B, S, F = enc.shape
    h = hidden[0]
    H = h.shape[-1]
    attn_params = jnp.concatenate(
        [enc,
         jnp.broadcast_to(h[:, None, :], (B, S, H)),
         jnp.broadcast_to(inp.reshape(B, 1, 1), (B, S, 1))], axis=2)
    aw = attn_params @ params["attn_w"].T + params["attn_b"]     # (B, S, 1)
    aw = jnp.where(mask[:, :, None] == 0, -1e10, aw)
    aw = jax.nn.softmax(aw, axis=1)
    attn_applied = jnp.einsum("bso,bsf->bf", aw, enc)            # (B, F)
    o = jnp.concatenate([inp[:, None], attn_applied], axis=1)    # (B, F+1)
    o = jnp.maximum(o @ params["comb_w"].T + params["comb_b"], 0.0)
    gi = o @ params["gru_w_ih"].T + params["gru_b_ih"]
    gh = h @ params["gru_w_hh"].T + params["gru_b_hh"]
    r = jax.nn.sigmoid(gi[:, :H] + gh[:, :H])
    z = jax.nn.sigmoid(gi[:, H:2 * H] + gh[:, H:2 * H])
    n = jnp.tanh(gi[:, 2 * H:] + r * gh[:, 2 * H:])
    h_new = (1.0 - z) * n + z * h
    oo = jnp.maximum(h_new, 0.0)
    out = oo @ params["out_w"].T + params["out_b"]
    return out[:, 0], h_new[None], aw


if __name__ == "__main__":
    B, S, F, H, T = 8, 8, 16, 32, 4   # batch, attn points, feature_size, hidden_size, steps
    key = jax.random.PRNGKey(0)
    ks = jax.random.split(key, 11)

    inp = jax.random.normal(ks[0], (B,), jnp.float32)
    hidden = jax.random.normal(ks[1], (1, B, H), jnp.float32)
    enc = jax.random.normal(ks[2], (B, S, F), jnp.float32)
    mask = (jax.random.uniform(ks[3], (B, S)) > 0.3).astype(jnp.float32)

    def linear_init(k, out_f, in_f):
        bound = 1.0 / (in_f ** 0.5)
        kw, kb = jax.random.split(k)
        W = jax.random.uniform(kw, (out_f, in_f), jnp.float32, -bound, bound)
        b = jax.random.uniform(kb, (out_f,), jnp.float32, -bound, bound)
        return W, b

    W_a, b_a = linear_init(ks[4], 1, F + H + 1)
    W_c, b_c = linear_init(ks[5], H, F + 1)
    W_ih, b_ih = linear_init(ks[6], 3 * H, H)
    W_hh, b_hh = linear_init(ks[7], 3 * H, H)
    W_o, b_o = linear_init(ks[8], 1, H)

    params = dict(attn_w=W_a, attn_b=b_a, comb_w=W_c, comb_b=b_c,
                  gru_w_ih=W_ih, gru_b_ih=b_ih, gru_w_hh=W_hh, gru_b_hh=b_hh,
                  out_w=W_o, out_b=b_o)

    # ---- 1) single decoder step (exact module semantics, T=1) ----------------
    out, hid, attnw = attn_decoder_forward(params, inp, hidden, enc, mask)
    jax.block_until_ready((out, hid, attnw))
    ref_out, ref_hid, ref_aw = reference_forward(params, inp, hidden, enc, mask)
    assert out.shape == (B,) and hid.shape == (1, B, H) and attnw.shape == (B, S, 1)
    assert jnp.allclose(out, ref_out, atol=2e-4, rtol=2e-4)
    assert jnp.allclose(hid, ref_hid, atol=2e-4, rtol=2e-4)
    assert jnp.allclose(attnw, ref_aw, atol=2e-4, rtol=2e-4)

    # ---- 2) internalized T-step decode loop (the main optimization) ----------
    # Weights are prepared once (hoisted), stay resident in VMEM for all steps,
    # and the hidden state is carried in VMEM scratch across the grid.
    prepped = prepare_params(params, S, F, H)
    act = prepare_inputs(prepped, hidden, enc, mask)
    inp_seq = jax.random.normal(ks[9], (T, B, 1), jnp.float32)
    outs_T, hid_T, aw_T = attn_decoder_decode(prepped, act, inp_seq)
    jax.block_until_ready((outs_T, hid_T, aw_T))

    h_ref = hidden
    for t in range(T):
        o_t, h_ref, aw_t = reference_forward(params, inp_seq[t, :, 0], h_ref, enc, mask)
        assert jnp.allclose(outs_T[t], o_t, atol=5e-4, rtol=5e-4)
        assert jnp.allclose(aw_T[t], aw_t[..., 0], atol=5e-4, rtol=5e-4)
    assert jnp.allclose(hid_T, h_ref[0], atol=5e-4, rtol=5e-4)

    print("KERNEL_OK")
</pallas_src>

<mosaic_0001>
module attributes {stable_mosaic.version = 11 : i64} {
  func.func @attn_decoder_kernel(%arg0: i32, %arg1: memref<1x8x1xf32, #tpu.memory_space<vmem>>, %arg2: memref<8x384xf32, #tpu.memory_space<vmem>>, %arg3: memref<128x256xf32, #tpu.memory_space<vmem>>, %arg4: memref<64x128xf32, #tpu.memory_space<vmem>>, %arg5: memref<8x128xf32, #tpu.memory_space<vmem>>, %arg6: memref<128x128xf32, #tpu.memory_space<vmem>>, %arg7: memref<1x8x256xf32, #tpu.memory_space<vmem>>, %arg8: memref<8x32xf32, #tpu.memory_space<vmem>>, %arg9: memref<8x32xf32, #tpu.memory_space<vmem>>) attributes {dimension_semantics = [#tpu.dimension_semantics<arbitrary>], iteration_bounds = array<i64: 1>, scalar_prefetch = 0 : i64, scratch_operands = 1 : i64, tpu.core_type = #tpu.core_type<tc>, window_params = [{transform_indices = @transform_0, window_bounds = array<i64: 1, 8, 1>}, {pipeline_mode = #tpu.pipeline_mode<synchronous>, transform_indices = @transform_1, window_bounds = array<i64: 8, 384>}, {pipeline_mode = #tpu.pipeline_mode<synchronous>, transform_indices = @transform_2, window_bounds = array<i64: 128, 256>}, {pipeline_mode = #tpu.pipeline_mode<synchronous>, transform_indices = @transform_3, window_bounds = array<i64: 64, 128>}, {pipeline_mode = #tpu.pipeline_mode<synchronous>, transform_indices = @transform_4, window_bounds = array<i64: 8, 128>}, {pipeline_mode = #tpu.pipeline_mode<synchronous>, transform_indices = @transform_5, window_bounds = array<i64: 128, 128>}, {transform_indices = @transform_6, window_bounds = array<i64: 1, 8, 256>}, {pipeline_mode = #tpu.pipeline_mode<synchronous>, transform_indices = @transform_7, window_bounds = array<i64: 8, 32>}]} {
    %c0_i32 = arith.constant 0 : i32
    %0 = arith.cmpi eq, %arg0, %c0_i32 : i32
    %1 = arith.extui %0 : i1 to i32
    %c0_i32_0 = arith.constant 0 : i32
    %2 = arith.cmpi ne, %1, %c0_i32_0 : i32
    scf.if %2 {
      %c0_46 = arith.constant 0 : index
      %c256 = arith.constant 256 : index
      %101 = vector.load %arg2[%c0_46, %c256] : memref<8x384xf32, #tpu.memory_space<vmem>>, vector<8x32xf32>
      %c0_47 = arith.constant 0 : index
      %c0_48 = arith.constant 0 : index
      %102 = vector.load %arg9[%c0_47, %c0_48] : memref<8x32xf32, #tpu.memory_space<vmem>>, vector<8x32xf32>
      tpu.vector_store %arg9[%c0_47, %c0_48], %101 {strides = array<i32>} : memref<8x32xf32, #tpu.memory_space<vmem>>, vector<8x32xf32>,
    } else {
    }
    %c0 = arith.constant 0 : index
    %c0_1 = arith.constant 0 : index
    %3 = vector.load %arg9[%c0, %c0_1] : memref<8x32xf32, #tpu.memory_space<vmem>>, vector<8x32xf32>
    %c0_2 = arith.constant 0 : index
    %c0_3 = arith.constant 0 : index
    %c0_4 = arith.constant 0 : index
    %4 = vector.load %arg1[%c0_2, %c0_3, %c0_4] : memref<1x8x1xf32, #tpu.memory_space<vmem>>, vector<1x8x1xf32>
    %5 = vector.shape_cast %4 : vector<1x8x1xf32> to vector<8x1xf32>
    %c0_5 = arith.constant 0 : index
    %c0_6 = arith.constant 0 : index
    %6 = vector.load %arg2[%c0_5, %c0_6] : memref<8x384xf32, #tpu.memory_space<vmem>>, vector<8x128xf32>
    %c0_7 = arith.constant 0 : index
    %c128 = arith.constant 128 : index
    %7 = vector.load %arg2[%c0_7, %c128] : memref<8x384xf32, #tpu.memory_space<vmem>>, vector<8x128xf32>
    %c0_8 = arith.constant 0 : index
    %c0_9 = arith.constant 0 : index
    %8 = vector.load %arg5[%c0_8, %c0_9] : memref<8x128xf32, #tpu.memory_space<vmem>>, vector<1x128xf32>
    %c1 = arith.constant 1 : index
    %c0_10 = arith.constant 0 : index
    %9 = vector.load %arg5[%c1, %c0_10] : memref<8x128xf32, #tpu.memory_space<vmem>>, vector<1x128xf32>
    %c2 = arith.constant 2 : index
    %c0_11 = arith.constant 0 : index
    %10 = vector.load %arg5[%c2, %c0_11] : memref<8x128xf32, #tpu.memory_space<vmem>>, vector<1x32xf32>
    %c3 = arith.constant 3 : index
    %c0_12 = arith.constant 0 : index
    %11 = vector.load %arg5[%c3, %c0_12] : memref<8x128xf32, #tpu.memory_space<vmem>>, vector<1x32xf32>
    %c4 = arith.constant 4 : index
    %c0_13 = arith.constant 0 : index
    %12 = vector.load %arg5[%c4, %c0_13] : memref<8x128xf32, #tpu.memory_space<vmem>>, vector<1x32xf32>
    %c5 = arith.constant 5 : index
    %c0_14 = arith.constant 0 : index
    %13 = vector.load %arg5[%c5, %c0_14] : memref<8x128xf32, #tpu.memory_space<vmem>>, vector<1x1xf32>
    %c6 = arith.constant 6 : index
    %c0_15 = arith.constant 0 : index
    %14 = vector.load %arg5[%c6, %c0_15] : memref<8x128xf32, #tpu.memory_space<vmem>>, vector<1x1xf32>
    %c32 = arith.constant 32 : index
    %c0_16 = arith.constant 0 : index
    %15 = vector.load %arg4[%c32, %c0_16] : memref<64x128xf32, #tpu.memory_space<vmem>>, vector<32x128xf32>
    %cst = arith.constant dense<0.000000e+00> : vector<8x128xf32>
    %16 = tpu.matmul %3, %15, %cst {dimension_numbers = #tpu.dot_dimension_numbers<[1], [0], [0], [1], [0, 0, 1, 1], [], []>} : vector<8x32xf32>, vector<32x128xf32>, vector<8x128xf32> -> vector<8x128xf32>
    %17 = vector.broadcast %9 : vector<1x128xf32> to vector<8x128xf32>
    %18 = arith.addf %16, %17 : vector<8x128xf32>
    %19 = vector.extract_strided_slice %18 {offsets = [0, 96], sizes = [8, 1], strides = [1, 1]} : vector<8x128xf32> to vector<8x1xf32>
    %c0_17 = arith.constant 0 : index
    %c0_18 = arith.constant 0 : index
    %20 = vector.load %arg3[%c0_17, %c0_18] : memref<128x256xf32, #tpu.memory_space<vmem>>, vector<128x128xf32>
    %cst_19 = arith.constant dense<0.000000e+00> : vector<8x128xf32>
    %21 = tpu.matmul %6, %20, %cst_19 {dimension_numbers = #tpu.dot_dimension_numbers<[1], [0], [0], [1], [0, 0, 1, 1], [], []>} : vector<8x128xf32>, vector<128x128xf32>, vector<8x128xf32> -> vector<8x128xf32>
    %22 = vector.broadcast %19 : vector<8x1xf32> to vector<8x128xf32>
    %23 = arith.addf %21, %22 : vector<8x128xf32>
    %24 = vector.broadcast %13 : vector<1x1xf32> to vector<8x1xf32>
    %25 = arith.mulf %5, %24 : vector<8x1xf32>
    %26 = vector.broadcast %25 : vector<8x1xf32> to vector<8x128xf32>
    %27 = arith.addf %23, %26 : vector<8x128xf32>
    %28 = arith.minimumf %27, %7 : vector<8x128xf32>
    %cst_20 = arith.constant dense<0xFF800000> : vector<8xf32>
    %29 = vector.multi_reduction <maximumf>, %28, %cst_20 [1] : vector<8x128xf32> to vector<8xf32>
    %30 = vector.shape_cast %29 : vector<8xf32> to vector<8x1xf32>
    %31 = vector.broadcast %30 : vector<8x1xf32> to vector<8x128xf32>
    %32 = arith.subf %28, %31 : vector<8x128xf32>
    %33 = math.exp %32 : vector<8x128xf32>
    %cst_21 = arith.constant dense<0.000000e+00> : vector<8xf32>
    %34 = vector.multi_reduction <add>, %33, %cst_21 [1] : vector<8x128xf32> to vector<8xf32>
    %35 = vector.shape_cast %34 : vector<8xf32> to vector<8x1xf32>
    %36 = tpu.reciprocal %35 {approx = true} : vector<8x1xf32> -> vector<8x1xf32>
    %37 = arith.mulf %35, %36 : vector<8x1xf32>
    %cst_22 = arith.constant 2.000000e+00 : f32
    %38 = vector.broadcast %cst_22 : f32 to vector<8x1xf32>
    %39 = arith.subf %38, %37 : vector<8x1xf32>
    %40 = arith.mulf %36, %39 : vector<8x1xf32>
    %41 = vector.broadcast %40 : vector<8x1xf32> to vector<8x128xf32>
    %42 = arith.mulf %33, %41 : vector<8x128xf32>
    %c0_23 = arith.constant 0 : index
    %c0_24 = arith.constant 0 : index
    %43 = vector.load %arg6[%c0_23, %c0_24] : memref<128x128xf32, #tpu.memory_space<vmem>>, vector<128x128xf32>
    %cst_25 = arith.constant dense<0.000000e+00> : vector<8x128xf32>
    %44 = tpu.matmul %42, %43, %cst_25 {dimension_numbers = #tpu.dot_dimension_numbers<[1], [0], [0], [1], [0, 0, 1, 1], [], []>} : vector<8x128xf32>, vector<128x128xf32>, vector<8x128xf32> -> vector<8x128xf32>
    %45 = arith.mulf %44, %6 : vector<8x128xf32>
    %46 = vector.broadcast %5 : vector<8x1xf32> to vector<8x32xf32>
    %47 = vector.broadcast %10 : vector<1x32xf32> to vector<8x32xf32>
    %48 = arith.mulf %46, %47 : vector<8x32xf32>
    %c0_26 = arith.constant 0 : index
    %c128_27 = arith.constant 128 : index
    %49 = vector.load %arg3[%c0_26, %c128_27] : memref<128x256xf32, #tpu.memory_space<vmem>>, vector<128x32xf32>
    %cst_28 = arith.constant dense<0.000000e+00> : vector<8x32xf32>
    %50 = tpu.matmul %45, %49, %cst_28 {dimension_numbers = #tpu.dot_dimension_numbers<[1], [0], [0], [1], [0, 0, 1, 1], [], []>} : vector<8x128xf32>, vector<128x32xf32>, vector<8x32xf32> -> vector<8x32xf32>
    %51 = arith.addf %48, %50 : vector<8x32xf32>
    %52 = vector.broadcast %11 : vector<1x32xf32> to vector<8x32xf32>
    %53 = arith.addf %51, %52 : vector<8x32xf32>
    %cst_29 = arith.constant 0.000000e+00 : f32
    %54 = vector.broadcast %cst_29 : f32 to vector<8x32xf32>
    %55 = arith.maximumf %53, %54 : vector<8x32xf32>
    %c0_30 = arith.constant 0 : index
    %c0_31 = arith.constant 0 : index
    %56 = vector.load %arg4[%c0_30, %c0_31] : memref<64x128xf32, #tpu.memory_space<vmem>>, vector<32x128xf32>
    %cst_32 = arith.constant dense<0.000000e+00> : vector<8x128xf32>
    %57 = tpu.matmul %55, %56, %cst_32 {dimension_numbers = #tpu.dot_dimension_numbers<[1], [0], [0], [1], [0, 0, 1, 1], [], []>} : vector<8x32xf32>, vector<32x128xf32>, vector<8x128xf32> -> vector<8x128xf32>
    %58 = vector.broadcast %8 : vector<1x128xf32> to vector<8x128xf32>
    %59 = arith.addf %57, %58 : vector<8x128xf32>
    %60 = vector.extract_strided_slice %59 {offsets = [0, 0], sizes = [8, 32], strides = [1, 1]} : vector<8x128xf32> to vector<8x32xf32>
    %61 = vector.extract_strided_slice %18 {offsets = [0, 0], sizes = [8, 32], strides = [1, 1]} : vector<8x128xf32> to vector<8x32xf32>
    %62 = arith.addf %60, %61 : vector<8x32xf32>
    %63 = arith.negf %62 : vector<8x32xf32>
    %64 = math.exp %63 : vector<8x32xf32>
    %cst_33 = arith.constant 1.000000e+00 : f32
    %65 = vector.broadcast %cst_33 : f32 to vector<8x32xf32>
    %66 = arith.addf %65, %64 : vector<8x32xf32>
    %67 = arith.divf %65, %66 : vector<8x32xf32>
    %68 = vector.extract_strided_slice %59 {offsets = [0, 32], sizes = [8, 32], strides = [1, 1]} : vector<8x128xf32> to vector<8x32xf32>
    %69 = vector.extract_strided_slice %18 {offsets = [0, 32], sizes = [8, 32], strides = [1, 1]} : vector<8x128xf32> to vector<8x32xf32>
    %70 = arith.addf %68, %69 : vector<8x32xf32>
    %71 = arith.negf %70 : vector<8x32xf32>
    %72 = math.exp %71 : vector<8x32xf32>
    %cst_34 = arith.constant 1.000000e+00 : f32
    %73 = vector.broadcast %cst_34 : f32 to vector<8x32xf32>
    %74 = arith.addf %73, %72 : vector<8x32xf32>
    %75 = arith.divf %73, %74 : vector<8x32xf32>
    %76 = vector.extract_strided_slice %59 {offsets = [0, 64], sizes = [8, 32], strides = [1, 1]} : vector<8x128xf32> to vector<8x32xf32>
    %77 = vector.extract_strided_slice %18 {offsets = [0, 64], sizes = [8, 32], strides = [1, 1]} : vector<8x128xf32> to vector<8x32xf32>
    %78 = arith.mulf %67, %77 : vector<8x32xf32>
    %79 = arith.addf %76, %78 : vector<8x32xf32>
    %80 = math.tanh %79 : vector<8x32xf32>
    %cst_35 = arith.constant 1.000000e+00 : f32
    %81 = vector.broadcast %cst_35 : f32 to vector<8x32xf32>
    %82 = arith.subf %81, %75 : vector<8x32xf32>
    %83 = arith.mulf %82, %80 : vector<8x32xf32>
    %84 = arith.mulf %75, %3 : vector<8x32xf32>
    %85 = arith.addf %83, %84 : vector<8x32xf32>
    %cst_36 = arith.constant 0.000000e+00 : f32
    %86 = vector.broadcast %cst_36 : f32 to vector<8x32xf32>
    %87 = arith.maximumf %85, %86 : vector<8x32xf32>
    %88 = vector.broadcast %12 : vector<1x32xf32> to vector<8x32xf32>
    %89 = arith.mulf %87, %88 : vector<8x32xf32>
    %cst_37 = arith.constant dense<0.000000e+00> : vector<8xf32>
    %90 = vector.multi_reduction <add>, %89, %cst_37 [1] : vector<8x32xf32> to vector<8xf32>
    %91 = vector.shape_cast %90 : vector<8xf32> to vector<8x1xf32>
    %92 = vector.broadcast %14 : vector<1x1xf32> to vector<8x1xf32>
    %93 = arith.addf %91, %92 : vector<8x1xf32>
    %c0_38 = arith.constant 0 : index
    %c0_39 = arith.constant 0 : index
    %94 = vector.load %arg9[%c0_38, %c0_39] : memref<8x32xf32, #tpu.memory_space<vmem>>, vector<8x32xf32>
    tpu.vector_store %arg9[%c0_38, %c0_39], %85 {strides = array<i32>} : memref<8x32xf32, #tpu.memory_space<vmem>>, vector<8x32xf32>,
    %c0_40 = arith.constant 0 : index
    %c0_41 = arith.constant 0 : index
    %95 = vector.load %arg8[%c0_40, %c0_41] : memref<8x32xf32, #tpu.memory_space<vmem>>, vector<8x32xf32>
    tpu.vector_store %arg8[%c0_40, %c0_41], %85 {strides = array<i32>} : memref<8x32xf32, #tpu.memory_space<vmem>>, vector<8x32xf32>,
    %cst_42 = arith.constant 0.000000e+00 : f32
    %96 = vector.broadcast %cst_42 : f32 to vector<8x127xf32>
    %97 = tpu.concatenate %42, %93, %96 in 1 : vector<8x128xf32>, vector<8x1xf32>, vector<8x127xf32> -> vector<8x256xf32>
    %c0_43 = arith.constant 0 : index
    %c0_44 = arith.constant 0 : index
    %c0_45 = arith.constant 0 : index
    %98 = vector.load %arg7[%c0_43, %c0_44, %c0_45] : memref<1x8x256xf32, #tpu.memory_space<vmem>>, vector<1x8x256xf32>
    %99 = vector.shape_cast %98 : vector<1x8x256xf32> to vector<8x256xf32>
    %100 = vector.shape_cast %97 : vector<8x256xf32> to vector<1x8x256xf32>
    tpu.vector_store %arg7[%c0_43, %c0_44, %c0_45], %100 {strides = array<i32>} : memref<1x8x256xf32, #tpu.memory_space<vmem>>, vector<1x8x256xf32>,
    return
  }
  func.func @transform_0(%arg0: i32) -> (i32, i32, i32) {
    %c0_i32 = arith.constant 0 : i32
    %c0_i32_0 = arith.constant 0 : i32
    %c0_i32_1 = arith.constant 0 : i32
    return %arg0, %c0_i32, %c0_i32_0 : i32, i32, i32
  }
  func.func @transform_1(%arg0: i32) -> (i32, i32) {
    %c0_i32 = arith.constant 0 : i32
    %c0_i32_0 = arith.constant 0 : i32
    %c0_i32_1 = arith.constant 0 : i32
    return %c0_i32, %c0_i32_0 : i32, i32
  }
  func.func @transform_2(%arg0: i32) -> (i32, i32) {
    %c0_i32 = arith.constant 0 : i32
    %c0_i32_0 = arith.constant 0 : i32
    %c0_i32_1 = arith.constant 0 : i32
    return %c0_i32, %c0_i32_0 : i32, i32
  }
  func.func @transform_3(%arg0: i32) -> (i32, i32) {
    %c0_i32 = arith.constant 0 : i32
    %c0_i32_0 = arith.constant 0 : i32
    %c0_i32_1 = arith.constant 0 : i32
    return %c0_i32, %c0_i32_0 : i32, i32
  }
  func.func @transform_4(%arg0: i32) -> (i32, i32) {
    %c0_i32 = arith.constant 0 : i32
    %c0_i32_0 = arith.constant 0 : i32
    %c0_i32_1 = arith.constant 0 : i32
    return %c0_i32, %c0_i32_0 : i32, i32
  }
  func.func @transform_5(%arg0: i32) -> (i32, i32) {
    %c0_i32 = arith.constant 0 : i32
    %c0_i32_0 = arith.constant 0 : i32
    %c0_i32_1 = arith.constant 0 : i32
    return %c0_i32, %c0_i32_0 : i32, i32
  }
  func.func @transform_6(%arg0: i32) -> (i32, i32, i32) {
    %c0_i32 = arith.constant 0 : i32
    %c0_i32_0 = arith.constant 0 : i32
    %c0_i32_1 = arith.constant 0 : i32
    return %arg0, %c0_i32, %c0_i32_0 : i32, i32, i32
  }
  func.func @transform_7(%arg0: i32) -> (i32, i32) {
    %c0_i32 = arith.constant 0 : i32
    %c0_i32_0 = arith.constant 0 : i32
    %c0_i32_1 = arith.constant 0 : i32
    return %c0_i32, %c0_i32_0 : i32, i32
  }
}

</mosaic_0001>

<bundles_post_ra>
// kernel: tpu_custom_call.1
= control target key start
LH: loop header
LB: loop body
LE: loop exit
PB: predicated region body
PF: predicated region fallthrough
CT: control target
= control target key end

     0   :  { %13 = vsyncpa [#allocation4], 0  ;;  %s1329_s0 = inlined_call_operand.vmem [shape: f32[1,8,1], index: 0, kind: input, shape index: {}]   ;;  %s1330_s1 = inlined_call_operand.hbm [shape: f32[8,384], index: 1, kind: input, shape index: {}]   ;;  %s1331_s2 = inlined_call_operand.hbm [shape: f32[128,256], index: 2, kind: input, shape index: {}]   ;;  %s1332_s3 = inlined_call_operand.hbm [shape: f32[64,128], index: 3, kind: input, shape index: {}]   ;;  %s1333_s4 = inlined_call_operand.vmem [shape: f32[8,128], index: 4, kind: input, shape index: {}]   ;;  %s1334_s5 = inlined_call_operand.hbm [shape: f32[128,128], index: 5, kind: input, shape index: {}]   ;;  %s1335_s6 = inlined_call_operand.hbm [shape: f32[1,8,256], index: 6, kind: output, shape index: {0}]   ;;  %s1336_s7 = inlined_call_operand.hbm [shape: f32[8,32], index: 7, kind: output, shape index: {1}]  }
   0x1   :  { %14 = vsyncpa [#allocation7], 0 }
   0x2   :  { %15 = vsyncpa [#allocation10], 0 }
   0x3   :  { %16 = vsyncpa [#allocation5], 0 }
   0x4   :  { %17 = vsyncpa [#allocation13], 0  ;;  %s1112_s24 = smov [#allocation6]   ;;  %s970_s28 = scalar_lea.hbm %s1331_s2, 4096 }
   0x5   :  { %s35_s25 = sshll.u32 %s1112_s24, 4  ;;  %p971_p0 = scmp.ne.s32.totalorder %s1331_s2, %s970_s28  ;;  %s36_s25 = int_to_ptr.vmem [resolvable:$true] %s35_s25 }
   0x6   :  { %p974_p1 = scmp.lt.u32.totalorder %s970_s28, %s1331_s2 }
   0x8   :  { %p976_p2 = pnand %p974_p1, %p971_p0 }
   0xa   :  { %979 = shalt.err (!%p976_p2)
}
   0xb   :  { %s980_s10 = scalar_lea.vmem %s36_s25, 4096  ;;  %p985_p4 = scmp.lt.s32.totalorder %s36_s25, %s36_s25 }
   0xc   :  { %p981_p3 = scmp.ne.s32.totalorder %s36_s25, %s980_s10  ;;  %p986_p5 = scmp.lt.s32.totalorder %s980_s10, %s980_s10 }
   0xe   :  { %p987_p6 = por %p986_p5, %p985_p4 }
  0x10   :  { %p988_p7 = pnand %p987_p6, %p981_p3 }
  0x12   :  { %991 = shalt.err (!%p988_p7)
}
  0x13   :  { %s1113_s11 = smov 256   ;;  %s1114_s12 = smov 16  }
  0x14   :  { %41 = dma.hbm_to_vmem [thread:$0]  %s1331_s2, 4096, %s36_s25, [#allocation7], %s1113_s11, %s1113_s11, %s1114_s12  }
  0x15   :  { %s1115_s15 = smov [#allocation3]   ;;  %s1116_s17 = smov [#allocation8]  }
  0x16   :  { %s26_s16 = sshll.u32 %s1115_s15, 4  ;;  %s47_s18 = sshll.u32 %s1116_s17, 4  ;;  %s27_s16 = int_to_ptr.vmem [resolvable:$true] %s26_s16  ;;  %s48_s18 = int_to_ptr.vmem [resolvable:$true] %s47_s18 }
  0x17   :  { %s992_s21 = scalar_lea.hbm %s1330_s1, 384 }
  0x18   :  { %p993_p8 = scmp.ne.s32.totalorder %s1330_s1, %s992_s21  ;;  %p996_p9 = scmp.lt.u32.totalorder %s992_s21, %s1330_s1 }
  0x1a   :  { %p998_p10 = pnand %p996_p9, %p993_p8 }
  0x1c   :  { %1001 = shalt.err (!%p998_p10)
}
  0x1d   :  { %s1002_s2 = scalar_lea.vmem %s27_s16, 384  ;;  %p1007_p12 = scmp.lt.s32.totalorder %s27_s16, %s27_s16 }
  0x1e   :  { %p1003_p11 = scmp.ne.s32.totalorder %s27_s16, %s1002_s2  ;;  %p1008_p13 = scmp.lt.s32.totalorder %s1002_s2, %s1002_s2 }
  0x20   :  { %p1009_p0 = por %p1008_p13, %p1007_p12 }
  0x22   :  { %p1010_p1 = pnand %p1009_p0, %p1003_p11 }
  0x24   :  { %1013 = shalt.err (!%p1010_p1)
}
  0x25   :  { %29 = dma.hbm_to_vmem [thread:$0]  %s1330_s1, 384, %s27_s16, [#allocation4]  }
  0x26   :  { %s1014_s30 = scalar_lea.hbm %s1332_s3, 1024 }
  0x27   :  { %p1015_p2 = scmp.ne.s32.totalorder %s1332_s3, %s1014_s30  ;;  %p1018_p3 = scmp.lt.u32.totalorder %s1014_s30, %s1332_s3 }
  0x29   :  { %p1020_p4 = pnand %p1018_p3, %p1015_p2 }
  0x2b   :  { %1023 = shalt.err (!%p1020_p4)
}
  0x2c   :  { %s1024_s12 = scalar_lea.vmem %s48_s18, 1024  ;;  %p1029_p6 = scmp.lt.s32.totalorder %s48_s18, %s48_s18 }
  0x2d   :  { %p1025_p5 = scmp.ne.s32.totalorder %s48_s18, %s1024_s12  ;;  %p1030_p7 = scmp.lt.s32.totalorder %s1024_s12, %s1024_s12 }
  0x2f   :  { %p1031_p8 = por %p1030_p7, %p1029_p6 }
  0x31   :  { %p1032_p9 = pnand %p1031_p8, %p1025_p5 }
  0x33   :  { %1035 = shalt.err (!%p1032_p9)
}
  0x34   :  { %s1117_s1 = smov 128   ;;  %s1118_s13 = smov 8  }
  0x35   :  { %53 = dma.hbm_to_vmem [thread:$0]  %s1332_s3, 1024, %s48_s18, [#allocation7], %s1117_s1, %s1117_s1, %s1118_s13  }
  0x36   :  { %s1119_s16 = smov [#allocation9]   ;;  %s1036_s21 = scalar_lea.hbm %s1334_s5, 2048 }
  0x37   :  { %s61_s17 = sshll.u32 %s1119_s16, 4  ;;  %p1037_p10 = scmp.ne.s32.totalorder %s1334_s5, %s1036_s21  ;;  %s62_s17 = int_to_ptr.vmem [resolvable:$true] %s61_s17 }
  0x38   :  { %p1040_p11 = scmp.lt.u32.totalorder %s1036_s21, %s1334_s5 }
  0x3a   :  { %p1042_p12 = pnand %p1040_p11, %p1037_p10 }
  0x3c   :  { %1045 = shalt.err (!%p1042_p12)
}
  0x3d   :  { %s1046_s2 = scalar_lea.vmem %s62_s17, 2048  ;;  %p1051_p0 = scmp.lt.s32.totalorder %s62_s17, %s62_s17 }
  0x3e   :  { %p1047_p13 = scmp.ne.s32.totalorder %s62_s17, %s1046_s2  ;;  %p1052_p1 = scmp.lt.s32.totalorder %s1046_s2, %s1046_s2 }
  0x40   :  { %p1053_p2 = por %p1052_p1, %p1051_p0 }
  0x42   :  { %p1054_p3 = pnand %p1053_p2, %p1047_p13 }
  0x44   :  { %1057 = shalt.err (!%p1054_p3)
}
  0x45   :  { %67 = dma.hbm_to_vmem [thread:$0]  %s1334_s5, 2048, %s62_s17, [#allocation10], %s1117_s1, %s1117_s1, %s1118_s13  }
  0x46   :  { %1102 = dma.done.wait [#allocation4], 384  }
  0x47   :  { %1103 = vsyncadd [#allocation4], 4294966912 }
  0x48   :  { %1104 = dma.done.wait [#allocation7], 5120  }
  0x49   :  { %1105 = vsyncadd [#allocation7], 4294962176 }
  0x4a   :  { %1106 = dma.done.wait [#allocation10], 2048  }
  0x4b   :  { %1107 = vsyncadd [#allocation10], 4294965248  ;;  %v1120_v0 = vmov 0.0|0.0   ;;  %vm1121_vm0 = vmmov 0   ;;  %v1122_v1 = vmov 0.0   ;;  %vm85_vm1 = vcmask 261120  }
  0x4c   :  { %855 = vmatprep.subr.bf16.mxu0 %v1120_v0  ;;  %736 = vmatprep.mubr.msk.f32.mxu0 %vm1121_vm0, %v1122_v1  ;;  %v98_v2 = vld [vmem:[#allocation8 + $0x20] sm:$0xff]  ;;  %v99_v3 = vld [vmem:[#allocation8 + $0x28] sm:$0xff]  ;;  %v100_v4 = vld [vmem:[#allocation8 + $0x30] sm:$0xff]  ;;  %v1123_v35 = vmov 96   ;;  %v1124_v36 = vmov 0   ;;  %s1125_s8 = smov 64  }
  0x4d   :  { %861 = vmatprep.subr.bf16.mxu1 %v1120_v0  ;;  %771 = vmatprep.mubr.msk.f32.mxu1 %vm1121_vm0, %v1122_v1  ;;  %v856_v5 = vpack.c.bf16 %v99_v3, %v98_v2  ;;  %v101_v6 = vld [vmem:[#allocation8 + $0x38] sm:$0xff]  ;;  %v180_v8 = vld [vmem:[#allocation6] sm:$0xff]  ;;  %v181_v9 = vld [vmem:[#allocation6 + $0x10] sm:$0xff]  ;;  %s1126_s15 = smov 32   ;;  %s1127_s16 = smov 96  }
  0x4e   :  { %v84_v7 = vld [vmem:[#allocation3 + $0x10] sm:$0xff]  ;;  %v182_v10 = vld [vmem:[#allocation6 + $0x20] sm:$0xff]  ;;  %v183_v11 = vld [vmem:[#allocation6 + $0x30] sm:$0xff]  ;;  %v859_v12 = vpack.c.bf16 %v101_v6, %v100_v4  ;;  %v862_v13 = vpack.c.bf16 %v181_v9, %v180_v8  ;;  %957 = vset.pattern.permute.xlu0 %v1123_v35  ;;  %959 = vset.pattern.permute.xlu1 %v1124_v36  ;;  %s1128_s17 = smov [#allocation12]  }
  0x4f   :  { %86 = vst.msk [vmem:[#allocation2] sm:$0xff] %vm85_vm1, %v84_v7  ;;  %857 = vmatpush3.bf16.msra.mxu0 %v856_v5  ;;  %v865_v14 = vpack.c.bf16 %v183_v11, %v182_v10  ;;  %v184_v15 = vld [vmem:[#allocation6 + $0x40] sm:$0xff]  ;;  %v185_v16 = vld [vmem:[#allocation6 + $0x50] sm:$0xff]  ;;  %v1240_v34 = vld [vmem:[#allocation3] sm:$0xff]  ;;  %s642_s19 = sshll.u32 %s1128_s17, 4  ;;  %s643_s19 = int_to_ptr.vmem [resolvable:$true] %s642_s19 }
  0x50   :  { %858 = vmatprep.subr.bf16.mxu0 %v1120_v0  ;;  %863 = vmatpush3.bf16.msra.mxu1 %v862_v13  ;;  %v868_v18 = vpack.c.bf16 %v185_v16, %v184_v15  ;;  %v186_v19 = vld [vmem:[#allocation6 + $0x60] sm:$0xff]  ;;  %v187_v20 = vld [vmem:[#allocation6 + $0x70] sm:$0xff]  ;;  %v657_v37 = vld [vmem:[%s1333_s4 + $0x1] ss:$0 sm:$0xff]  ;;  %s1058_s20 = scalar_lea.vmem %s643_s19, 128  ;;  %p1063_p5 = scmp.lt.s32.totalorder %s643_s19, %s643_s19 }
  0x51   :  { %864 = vmatprep.subr.bf16.mxu1 %v1120_v0  ;;  %v871_v21 = vpack.c.bf16 %v187_v20, %v186_v19  ;;  %v188_v22 = vld [vmem:[#allocation6 + $0x80] sm:$0xff]  ;;  %v189_v23 = vld [vmem:[#allocation6 + $0x90] sm:$0xff]  ;;  %v88_v41 = vld [vmem:[%s1329_s0] sm:$0xff]  ;;  %p1059_p4 = scmp.ne.s32.totalorder %s643_s19, %s1058_s20  ;;  %p1064_p6 = scmp.lt.s32.totalorder %s1058_s20, %s1058_s20 }
  0x52   :  { %v874_v24 = vpack.c.bf16 %v189_v23, %v188_v22  ;;  %v190_v25 = vld [vmem:[#allocation6 + $0xa0] sm:$0xff]  ;;  %v191_v26 = vld [vmem:[#allocation6 + $0xb0] sm:$0xff]  ;;  %v659_v42 = vld [vmem:[%s1333_s4 + $0x5] ss:$0 sm:$0xff] }
  0x53   :  { %860 = vmatpush3.bf16.msra.mxu0 %v859_v12  ;;  %v877_v27 = vpack.c.bf16 %v191_v26, %v190_v25  ;;  %v192_v28 = vld [vmem:[#allocation6 + $0xc0] sm:$0xff]  ;;  %v193_v29 = vld [vmem:[#allocation6 + $0xd0] sm:$0xff]  ;;  %v275_v43 = vmul.f32 %v659_v42, %v88_v41  ;;  %v296_v53 = vld [vmem:[#allocation9 + $0x8] sm:$0xff]  ;;  %p1065_p7 = por %p1064_p6, %p1063_p5 }
  0x54   :  { %885 = vmatprep.subr.bf16.mxu0 %v1120_v0  ;;  %866 = vmatpush3.bf16.msra.mxu1 %v865_v14  ;;  %v880_v30 = vpack.c.bf16 %v193_v29, %v192_v28  ;;  %v194_v31 = vld [vmem:[#allocation6 + $0xe0] sm:$0xff]  ;;  %v195_v32 = vld [vmem:[#allocation6 + $0xf0] sm:$0xff]  ;;  %v298_v56 = vld [vmem:[#allocation9 + $0x18] sm:$0xff] }
  0x55   :  { %867 = vmatprep.subr.bf16.mxu1 %v1120_v0  ;;  %v883_v33 = vpack.c.bf16 %v195_v32, %v194_v31  ;;  %v90_v49 = vld [vmem:[#allocation3 + $0x8] sm:$0xff]  ;;  %v295_v52 = vld [vmem:[#allocation9] sm:$0xff]  ;;  %v300_v59 = vld [vmem:[#allocation9 + $0x28] sm:$0xff]  ;;  %p1066_p8 = pnand %p1065_p7, %p1059_p4 }
  0x56   :  { %v1228_v17 = vld [vmem:[#allocation2] sm:$0xff]  ;;  %v297_v54 = vld [vmem:[#allocation9 + $0x10] sm:$0xff]  ;;  %v886_v55 = vpack.c.bf16 %v296_v53, %v295_v52  ;;  %v302_v4 = vld [vmem:[#allocation9 + $0x38] sm:$0xff] }
  0x57   :  { %737 = vmatmul.mubr.msk.f32.vlgmr.msra.gmra.mrb[0].mxu0 %vm85_vm1, %v1228_v17  ;;  %v889_v57 = vpack.c.bf16 %v298_v56, %v297_v54  ;;  %v299_v58 = vld [vmem:[#allocation9 + $0x20] sm:$0xff]  ;;  %v301_v3 = vld [vmem:[#allocation9 + $0x30] sm:$0xff]  ;;  %v304_v7 = vld [vmem:[#allocation9 + $0x48] sm:$0xff] }
  0x58   :  { %806 = vmatprep.mubr.msk.f32.mxu0 %vm1121_vm0, %v1122_v1  ;;  %869 = vmatpush3.bf16.msra.mxu1 %v868_v18  ;;  %v892_v60 = vpack.c.bf16 %v300_v59, %v299_v58  ;;  %v895_v5 = vpack.c.bf16 %v302_v4, %v301_v3  ;;  %v303_v6 = vld [vmem:[#allocation9 + $0x40] sm:$0xff]  ;;  %v305_v9 = vld [vmem:[#allocation9 + $0x50] sm:$0xff]  ;;  %v306_v10 = vld [vmem:[#allocation9 + $0x58] sm:$0xff] }
  0x59   :  { %870 = vmatprep.subr.bf16.mxu1 %v1120_v0  ;;  %887 = vmatpush3.bf16.msra.mxu0 %v886_v55  ;;  %v898_v8 = vpack.c.bf16 %v304_v7, %v303_v6  ;;  %v901_v11 = vpack.c.bf16 %v306_v10, %v305_v9  ;;  %v307_v12 = vld [vmem:[#allocation9 + $0x60] sm:$0xff]  ;;  %v308_v13 = vld [vmem:[#allocation9 + $0x68] sm:$0xff]  ;;  %v309_v15 = vld [vmem:[#allocation9 + $0x70] sm:$0xff] }
  0x5a   :  { %888 = vmatprep.subr.bf16.mxu0 %v1120_v0  ;;  %v904_v14 = vpack.c.bf16 %v308_v13, %v307_v12  ;;  %v310_v16 = vld [vmem:[#allocation9 + $0x78] sm:$0xff]  ;;  %v392_v19 = vld [vmem:[#allocation6 + $0x8] sm:$0xff]  ;;  %v485_v54 = vld [vmem:[#allocation8] sm:$0xff] }
  0x5b   :  { %v907_v18 = vpack.c.bf16 %v310_v16, %v309_v15  ;;  %v393_v20 = vld [vmem:[#allocation6 + $0x18] sm:$0xff]  ;;  %v396_v25 = vld [vmem:[#allocation6 + $0x48] sm:$0xff] }
  0x5c   :  { %872 = vmatpush3.bf16.msra.mxu1 %v871_v21  ;;  %v394_v21 = vld [vmem:[#allocation6 + $0x28] sm:$0xff]  ;;  %v910_v22 = vpack.c.bf16 %v393_v20, %v392_v19  ;;  %v395_v23 = vld [vmem:[#allocation6 + $0x38] sm:$0xff] }
  0x5d   :  { %873 = vmatprep.subr.bf16.mxu1 %v1120_v0  ;;  %890 = vmatpush3.bf16.msra.mxu0 %v889_v57  ;;  %v397_v26 = vld [vmem:[#allocation6 + $0x58] sm:$0xff]  ;;  %v398_v28 = vld [vmem:[#allocation6 + $0x68] sm:$0xff]  ;;  %v487_v57 = vld [vmem:[#allocation8 + $0x10] sm:$0xff] }
  0x5e   :  { %891 = vmatprep.subr.bf16.mxu0 %v1120_v0  ;;  %v399_v29 = vld [vmem:[#allocation6 + $0x78] sm:$0xff]  ;;  %v400_v31 = vld [vmem:[#allocation6 + $0x88] sm:$0xff] }
  0x5f   :  { %v401_v32 = vld [vmem:[#allocation6 + $0x98] sm:$0xff]  ;;  %v402_v35 = vld [vmem:[#allocation6 + $0xa8] sm:$0xff] }
  0x60   :  { %875 = vmatpush3.bf16.msra.mxu1 %v874_v24  ;;  %v913_v24 = vpack.c.bf16 %v395_v23, %v394_v21  ;;  %v486_v55 = vld [vmem:[#allocation8 + $0x8] sm:$0xff]  ;;  %v488_v58 = vld [vmem:[#allocation8 + $0x18] sm:$0xff] }
  0x61   :  { %876 = vmatprep.subr.bf16.mxu1 %v1120_v0  ;;  %893 = vmatpush3.bf16.msra.mxu0 %v892_v60  ;;  %v934_v56 = vpack.c.bf16 %v486_v55, %v485_v54  ;;  %v937_v59 = vpack.c.bf16 %v488_v58, %v487_v57  ;;  %v665_v15 = vld [vmem:[%s1333_s4 + $0x4] ss:$0 sm:$0xff] }
  0x62   :  { %894 = vmatprep.subr.bf16.mxu0 %v1120_v0 }
  0x64   :  { %878 = vmatpush3.bf16.msra.mxu1 %v877_v27  ;;  %v916_v27 = vpack.c.bf16 %v397_v26, %v396_v25 }
  0x65   :  { %879 = vmatprep.subr.bf16.mxu1 %v1120_v0  ;;  %896 = vmatpush3.bf16.msra.mxu0 %v895_v5 }
  0x66   :  { %897 = vmatprep.subr.bf16.mxu0 %v1120_v0 }
  0x68   :  { %881 = vmatpush3.bf16.msra.mxu1 %v880_v30  ;;  %v919_v30 = vpack.c.bf16 %v399_v29, %v398_v28 }
  0x69   :  { %882 = vmatprep.subr.bf16.mxu1 %v1120_v0  ;;  %899 = vmatpush3.bf16.msra.mxu0 %v898_v8 }
  0x6a   :  { %900 = vmatprep.subr.bf16.mxu0 %v1120_v0 }
  0x6c   :  { %884 = vmatpush3.bf16.msra.mxu1 %v883_v33  ;;  %v922_v33 = vpack.c.bf16 %v401_v32, %v400_v31 }
  0x6d   :  { %909 = vmatprep.subr.bf16.mxu1 %v1120_v0  ;;  %902 = vmatpush3.bf16.msra.mxu0 %v901_v11 }
  0x6e   :  { %903 = vmatprep.subr.bf16.mxu0 %v1120_v0 }
  0x6f   :  { %772 = vmatmul.mubr.f32.vlgmr.msra.gmra.mrb[0].mxu1 %v1240_v34 }
  0x70   :  { %841 = vmatprep.mubr.msk.f32.mxu1 %vm1121_vm0, %v1122_v1  ;;  %911 = vmatpush3.bf16.msra.mxu1 %v910_v22 }
  0x71   :  { %905 = vmatpush3.bf16.msra.mxu0 %v904_v14  ;;  %912 = vmatprep.subr.bf16.mxu1 %v1120_v0 }
  0x72   :  { %906 = vmatprep.subr.bf16.mxu0 %v1120_v0 }
  0x74   :  { %914 = vmatpush3.bf16.msra.mxu1 %v913_v24 }
  0x75   :  { %908 = vmatpush3.bf16.msra.mxu0 %v907_v18  ;;  %915 = vmatprep.subr.bf16.mxu1 %v1120_v0 }
  0x76   :  { %933 = vmatprep.subr.bf16.mxu0 %v1120_v0 }
  0x78   :  { %917 = vmatpush3.bf16.msra.mxu1 %v916_v27 }
  0x79   :  { %918 = vmatprep.subr.bf16.mxu1 %v1120_v0 }
  0x7c   :  { %920 = vmatpush3.bf16.msra.mxu1 %v919_v30 }
  0x7d   :  { %921 = vmatprep.subr.bf16.mxu1 %v1120_v0 }
  0x80   :  { %923 = vmatpush3.bf16.msra.mxu1 %v922_v33 }
  0x81   :  { %924 = vmatprep.subr.bf16.mxu1 %v1120_v0 }
 0x12a   :  { %v176_v38 = vpop.f32.mrb[0].mxu0 }
 0x12b   :  { %v1249_v39 = vadd.f32 %v657_v37, %v176_v38  ;;  %v738_v40 = vpop.f32.mrb[1].mxu0  ;;  %v404_v38 = vld [vmem:[#allocation6 + $0xc8] sm:$0xff] }
 0x12c   :  { %v405_v40 = vld [vmem:[#allocation6 + $0xd8] sm:$0xff] }
 0x12d   :  { %198 = vperm.xlu0 %957, %v1249_v39  }
 0x131   :  { %958 = vset.pattern.permute.xlu0 %v1124_v36  ;;  %v403_v36 = vld [vmem:[#allocation6 + $0xb8] sm:$0xff] }
 0x132   :  { %278 = vperm.xlu0 %958, %v275_v43   ;;  %v925_v37 = vpack.c.bf16 %v403_v36, %v402_v35 }
 0x134   :  { %926 = vmatpush3.bf16.msra.mxu1 %v925_v37 }
 0x135   :  { %927 = vmatprep.subr.bf16.mxu1 %v1120_v0 }
 0x136   :  { %573 = vrot.lane.b32.xlu0 %v1249_v39, %s1125_s8 }
 0x142   :  { %v267_v44 = vpop.f32.mrb[0].mxu1 }
 0x143   :  { %v773_v45 = vpop.f32.mrb[1].mxu1 }
 0x1ac   :  { %v199_v46 = vpop.permute.xlu0 %198 }
 0x1ad   :  { %v268_v47 = vadd.f32 %v267_v44, %v199_v46 }
 0x1b1   :  { %v279_v48 = vpop.permute.xlu0 %278 }
 0x1b2   :  { %v281_v50 = vadd.f32 %v279_v48, %v268_v47  ;;  %v406_v48 = vld [vmem:[#allocation6 + $0xe8] sm:$0xff] }
 0x1b4   :  { %v282_v51 = vmin.f32 %v281_v50, %v90_v49  ;;  %v407_v49 = vld [vmem:[#allocation6 + $0xf8] sm:$0xff] }
 0x1b5   :  { %v931_v50 = vpack.c.bf16 %v407_v49, %v406_v48  ;;  %v574_v13 = vpop.permute.xlu0 %573 }
 0x1b6   :  { %283 = vmax.xlane.f32.xlu1 %v282_v51 }
 0x243   :  { %v284_v61 = vpop.xlane.xlu1 %283 }
 0x244   :  { %v285_v62 = vsub.f32 %v282_v51, %v284_v61 }
 0x246   :  { %v286_v63 = vmul.f32 1.442695, %v285_v62 }
 0x248   :  { %960 = vpow2.f32 %v286_v63 }
 0x252   :  { %v1263_v2 = vpop.eup %960 }
 0x253   :  { %288 = vadd.xlane.f32.xlu1 %v1263_v2 }
 0x264   :  { %384 = vperm.xlu1 %959, %v88_v41   ;;  %v928_v41 = vpack.c.bf16 %v405_v40, %v404_v38 }
 0x266   :  { %929 = vmatpush3.bf16.msra.mxu1 %v928_v41 }
 0x267   :  { %930 = vmatprep.subr.bf16.mxu1 %v1120_v0 }
 0x268   :  { %600 = vrot.lane.b32.xlu1 %v665_v15, %s1126_s15 }
 0x26a   :  { %932 = vmatpush3.bf16.msra.mxu1 %v931_v50 }
 0x2e0   :  { %v289_v42 = vpop.xlane.xlu1 %288 }
 0x2e1   :  { %962 = vrcp.f32 %v289_v42 }
 0x2e4   :  { %v385_v60 = vpop.permute.xlu1 %384 }
 0x2e8   :  { %v601_v25 = vpop.permute.xlu1 %600 }
 0x2eb   :  { %v963_v43 = vpop.eup %962 }
 0x2ec   :  { %v291_v44 = vmul.f32 %v963_v43, %v289_v42 }
 0x2ee   :  { %v292_v45 = vsub.f32 2.0, %v291_v44 }
 0x2f0   :  { %v293_v46 = vmul.f32 %v963_v43, %v292_v45 }
 0x2f2   :  { %v294_v47 = vmul.f32 %v1263_v2, %v293_v46 }
 0x2f4   :  { %624 = vst [vmem:[#allocation11] sm:$0xff] %v294_v47  ;;  %807 = vmatmul.mubr.f32.vlgmr.msra.gmra.mrb[2].mxu0 %v294_v47 }
 0x2f5   :  { %852 = vmatprep.mubr.msk.f32.mxu0 %vm1121_vm0, %v1122_v1  ;;  %935 = vmatpush3.bf16.msra.mxu0 %v934_v56  ;;  %v660_v1 = vld [vmem:[%s1333_s4 + $0x2] ss:$0 sm:$0xff] }
 0x2f6   :  { %936 = vmatprep.subr.bf16.mxu0 %v1120_v0  ;;  %v391_v61 = vmul.f32 %v660_v1, %v385_v60  ;;  %v662_v0 = vld [vmem:[%s1333_s4] ss:$0 sm:$0xff] }
 0x2f9   :  { %938 = vmatpush3.bf16.msra.mxu0 %v937_v59 }
 0x3c7   :  { %v377_v51 = vpop.f32.mrb[2].mxu0 }
 0x3c8   :  { %v381_v52 = vmul.f32 %v377_v51, %v1240_v34  ;;  %v808_v53 = vpop.f32.mrb[3].mxu0  ;;  %v661_v34 = vld [vmem:[%s1333_s4 + $0x3] ss:$0 sm:$0xff] }
 0x3ca   :  { %842 = vmatmul.mubr.f32.vlgmr.msra.gmra.mrb[2].mxu1 %v381_v52 }
 0x49d   :  { %v474_v62 = vpop.f32.mrb[2].mxu1 }
 0x49e   :  { %v478_v63 = vadd.f32 %v474_v62, %v391_v61  ;;  %v843_v2 = vpop.f32.mrb[3].mxu1 }
 0x4a0   :  { %v483_v3 = vadd.f32 %v661_v34, %v478_v63 }
 0x4a2   :  { %v484_v4 = vmax.f32 %v483_v3, 0.0 }
 0x4a4   :  { %853 = vmatmul.mubr.msk.f32.vlgmr.msra.gmra.mrb[4].mxu0 %vm85_vm1, %v484_v4 }
 0x577   :  { %v562_v5 = vpop.f32.mrb[4].mxu0 }
 0x578   :  { %v563_v6 = vadd.f32 %v662_v0, %v562_v5  ;;  %v854_v7 = vpop.f32.mrb[5].mxu0 }
 0x57a   :  { %v566_v8 = vadd.f32 %v563_v6, %v1249_v39 }
 0x57c   :  { %v664_v9 = vmul.f32 -1.442695, %v566_v8 }
 0x57e   :  { %964 = vpow2.f32 %v664_v9 }
 0x588   :  { %v965_v10 = vpop.eup %964 }
 0x589   :  { %v570_v11 = vadd.f32 1.0, %v965_v10 }
 0x58b   :  { %966 = vrcp.f32 %v570_v11 }
 0x595   :  { %v967_v12 = vpop.eup %966 }
 0x596   :  { %v576_v14 = vmul.f32 %v967_v12, %v574_v13  ;;  %v583_v20 = vsub.f32 1.0, %v967_v12 }
 0x598   :  { %578 = vrot.lane.b32.xlu0 %v576_v14, %s1125_s8 }
 0x60a   :  { %v579_v16 = vpop.permute.xlu0 %578 }
 0x60b   :  { %v581_v18 = vadd.f32 %v579_v16, %v563_v6 }
 0x60d   :  { %968 = vtanh.f32 %v581_v18 }
 0x617   :  { %v969_v39 = vpop.eup %968 }
 0x618   :  { %585 = vrot.lane.b32.xlu0 %v969_v39, %s1127_s16 }
 0x61c   :  { %589 = vrot.lane.b32.xlu0 %v1228_v17, %s1126_s15 }
 0x68a   :  { %v586_v19 = vpop.permute.xlu0 %585 }
 0x68b   :  { %v588_v22 = vmul.f32 %v586_v19, %v583_v20 }
 0x68e   :  { %v590_v21 = vpop.permute.xlu0 %589 }
 0x68f   :  { %v592_v23 = vmul.f32 %v967_v12, %v590_v21 }
 0x691   :  { %v593_v24 = vadd.f32 %v592_v23, %v588_v22 }
 0x693   :  { %v594_v26 = vmax.f32 %v593_v24, 0.0 }
 0x695   :  { %v603_v27 = vmul.f32 %v601_v25, %v594_v26 }
 0x697   :  { %605 = vrot.lane.b32.xlu0 %v603_v27, %s1127_s16 }
 0x69b   :  { %617 = vrot.lane.b32.xlu0 %v593_v24, %s1127_s16 }
 0x709   :  { %v606_v28 = vpop.permute.xlu0 %605 }
 0x70a   :  { %v608_v29 = vsel %vm85_vm1, %v606_v28, 0.0 }
 0x70b   :  { %609 = vadd.xlane.f32.xlu1 %v608_v29 }
 0x70d   :  { %v618_v30 = vpop.permute.xlu0 %617 }
 0x70e   :  { %620 = vst.msk [vmem:[#allocation2] sm:$0xff] %vm85_vm1, %v618_v30  ;;  %621 = vst.msk [vmem:[#allocation12] sm:$0xff] %vm85_vm1, %v618_v30 }
 0x70f   :  { %1069 = shalt.err (!%p1066_p8)
}
 0x710   :  { %s1070_s23 = scalar_lea.hbm %s1336_s7, 128 }
 0x711   :  { %p1071_p9 = scmp.ne.s32.totalorder %s1336_s7, %s1070_s23  ;;  %p1074_p10 = scmp.lt.u32.totalorder %s1070_s23, %s1336_s7 }
 0x713   :  { %p1076_p11 = pnand %p1074_p10, %p1071_p9 }
 0x715   :  { %1079 = shalt.err (!%p1076_p11)
}
 0x716   :  { %645 = dma.vmem_to_hbm [thread:$0]  %s643_s19, 128, %s1336_s7, [#allocation13]   ;;  %v666_v17 = vld [vmem:[%s1333_s4 + $0x6] ss:$0 sm:$0xff]  ;;  %vm622_vm2 = vcmask 7168  }
 0x717   :  { %s1129_s28 = smov [#allocation11]  }
 0x718   :  { %s632_s29 = sshll.u32 %s1129_s28, 4  ;;  %s633_s29 = int_to_ptr.vmem [resolvable:$true] %s632_s29 }
 0x719   :  { %s1080_s30 = scalar_lea.vmem %s633_s29, 256  ;;  %p1085_p13 = scmp.lt.s32.totalorder %s633_s29, %s633_s29 }
 0x71a   :  { %p1081_p12 = scmp.ne.s32.totalorder %s633_s29, %s1080_s30  ;;  %p1086_p0 = scmp.lt.s32.totalorder %s1080_s30, %s1080_s30 }
 0x71c   :  { %p1087_p1 = por %p1086_p0, %p1085_p13 }
 0x71e   :  { %p1088_p2 = pnand %p1087_p1, %p1081_p12 }
 0x798   :  { %v610_v31 = vpop.xlane.xlu1 %609 }
 0x799   :  { %v615_v32 = vadd.f32 %v666_v17, %v610_v31 }
 0x79b   :  { %v623_v33 = vsel %vm622_vm2, %v615_v32, 0.0 }
 0x79c   :  { %625 = vst [vmem:[#allocation11 + $0x8] sm:$0xff] %v623_v33 }
 0x79d   :  { %1091 = shalt.err (!%p1088_p2)
}
 0x79e   :  { %s1092_s0 = scalar_lea.hbm %s1335_s6, 256 }
 0x79f   :  { %p1093_p3 = scmp.ne.s32.totalorder %s1335_s6, %s1092_s0  ;;  %p1096_p4 = scmp.lt.u32.totalorder %s1092_s0, %s1335_s6 }
 0x7a1   :  { %p1098_p5 = pnand %p1096_p4, %p1093_p3 }
 0x7a3   :  { %1101 = shalt.err (!%p1098_p5)
}
 0x7a4   :  { %635 = dma.vmem_to_hbm [thread:$0]  %s633_s29, 256, %s1335_s6, [#allocation5]  }
 0x7a5   :  { %1108 = dma.done.wait [#allocation5], 256  }
 0x7a6   :  { %1109 = vsyncadd [#allocation5], 4294967040 }
 0x7a7   :  { %1110 = dma.done.wait [#allocation13], 128  }
 0x7a8   :  { %1111 = vsyncadd [#allocation13], 4294967168 }
 0x7a9   :  { %652 = vsyncpa [#allocation4], 1 }
 0x7aa   :  { %653 = vsyncpa [#allocation7], 1 }
 0x7ab   :  { %654 = vsyncpa [#allocation10], 1 }
 0x7ac   :  { %655 = vsyncpa [#allocation5], 1 }
 0x7ad   :  { %656 = vsyncpa [#allocation13], 1 }

</bundles_post_ra>
